<compile_context>
chip_gen: v7x
topology: tpu7x:2x2x1
jax: 0.10.0
libtpu: 0.0.40
codegen_flags: <defaults>
</compile_context>

<pallas_src>
import jax
import jax.numpy as jnp
from jax.experimental import pallas as pl
from jax.experimental.pallas import tpu as pltpu

BN_EPS = 1e-5
LANE = 128


def _round_up(n, m):
    return (n + m - 1) // m * m


def _bn_relu(h, gamma, beta, inv_b):
    # Training-mode BatchNorm1d (biased batch variance) + ReLU, single pass:
    #   var = E[h^2] - E[h]^2 ;  y = h * scale + shift
    s = jnp.sum(h, axis=0, keepdims=True)
    sq = jnp.sum(h * h, axis=0, keepdims=True)
    mean = s * inv_b
    var = sq * inv_b - mean * mean
    scale = gamma * jax.lax.rsqrt(var + BN_EPS)
    shift = beta - mean * scale
    return jnp.maximum(h * scale + shift, 0.0)


def classifier_kernel(
    x_ref,
    w1_ref, g1_ref, be1_ref,
    w2_ref, g2_ref, be2_ref,
    w3_ref, g3_ref, be3_ref,
    w4_ref, b4_ref,
    o_ref,
):
    x = x_ref[...]
    inv_b = 1.0 / x.shape[0]

    # fc1..fc3 biases are omitted entirely: BN mean-subtraction cancels them.
    h1 = jnp.dot(x, w1_ref[...].astype(jnp.float32),
                 preferred_element_type=jnp.float32)
    h1 = _bn_relu(h1, g1_ref[...], be1_ref[...], inv_b)

    h2 = jnp.dot(h1, w2_ref[...].astype(jnp.float32),
                 preferred_element_type=jnp.float32)
    h2 = _bn_relu(h2, g2_ref[...], be2_ref[...], inv_b)

    h3 = jnp.dot(h2, w3_ref[...].astype(jnp.float32),
                 preferred_element_type=jnp.float32)
    h3 = _bn_relu(h3, g3_ref[...], be3_ref[...], inv_b)

    out = jnp.dot(h3, w4_ref[...].astype(jnp.float32),
                  preferred_element_type=jnp.float32) + b4_ref[...]
    o_ref[...] = out.astype(o_ref.dtype)  # lane-dense (B, 128) store


def classifier_forward(x, params, weights_dtype=jnp.bfloat16):
    B, F = x.shape
    out_size = params["w4"].shape[1]

    # Pad the input contraction dim to a lane-aligned 128 (zeros don't change x@W1).
    Fp = max(_round_up(F, LANE), LANE)
    x_p = jnp.pad(x, ((0, 0), (0, Fp - F))) if Fp != F else x
    w1 = params["w1"]
    w1 = jnp.pad(w1, ((0, Fp - F), (0, 0))) if Fp != F else w1

    # Pad fc4 columns so the kernel's output store is lane-dense (128-wide).
    Np = max(_round_up(out_size, LANE), LANE)
    w4 = params["w4"]
    b4 = params["b4"]
    if Np != out_size:
        w4 = jnp.pad(w4, ((0, 0), (0, Np - out_size)))
        b4 = jnp.pad(b4, ((0, 0), (0, Np - out_size)))

    # bf16 weights: halves weight DMA traffic; f32 accumulation in-kernel.
    w1 = w1.astype(weights_dtype)
    w2 = params["w2"].astype(weights_dtype)
    w3 = params["w3"].astype(weights_dtype)
    w4 = w4.astype(weights_dtype)

    args = (
        x_p,
        w1, params["g1"], params["be1"],
        w2, params["g2"], params["be2"],
        w3, params["g3"], params["be3"],
        w4, b4,
    )

    flops = 2 * B * (Fp * 512 + 512 * 128 + 128 * 64 + 64 * Np)
    bytes_accessed = sum(int(a.size) * a.dtype.itemsize for a in args) + B * Np * 4

    vmem_spec = pl.BlockSpec(memory_space=pltpu.MemorySpace.VMEM)
    out = pl.pallas_call(
        classifier_kernel,
        out_shape=jax.ShapeDtypeStruct((B, Np), jnp.float32),
        in_specs=[vmem_spec] * len(args),
        out_specs=vmem_spec,
        compiler_params=pltpu.CompilerParams(vmem_limit_bytes=32 * 1024 * 1024),
        cost_estimate=pl.CostEstimate(
            flops=flops, transcendentals=512 + 128 + 64,
            bytes_accessed=bytes_accessed),
    )(*args)
    return out[:, :out_size]


def init_params(key, input_size, output_size):
    """Deterministic init mirroring nn.Linear (uniform +-1/sqrt(fan_in)) and
    nn.BatchNorm1d (gamma=1, beta=0). Weights stored as (in, out)."""
    dims = [(input_size, 512), (512, 128), (128, 64), (64, output_size)]
    params = {}
    keys = jax.random.split(key, 2 * len(dims))
    for i, (fin, fout) in enumerate(dims):
        bound = 1.0 / (fin ** 0.5)
        params[f"w{i+1}"] = jax.random.uniform(
            keys[2 * i], (fin, fout), jnp.float32, minval=-bound, maxval=bound
        )
        params[f"b{i+1}"] = jax.random.uniform(
            keys[2 * i + 1], (1, fout), jnp.float32, minval=-bound, maxval=bound
        )
    for i, (_, fout) in enumerate(dims[:3]):
        params[f"g{i+1}"] = jnp.ones((1, fout), jnp.float32)
        params[f"be{i+1}"] = jnp.zeros((1, fout), jnp.float32)
    return params


def reference_forward(x, params, weights_dtype=jnp.float32):
    """Pure-JAX mirror of the PyTorch module (includes b1..b3, two-pass BN).
    `weights_dtype` lets the check use the same rounded weights as the kernel."""
    def w(name):
        return params[name].astype(weights_dtype).astype(jnp.float32)

    h = x
    for i in range(3):
        h = jnp.dot(h, w(f"w{i+1}")) + params[f"b{i+1}"]
        mean = jnp.mean(h, axis=0, keepdims=True)
        var = jnp.mean((h - mean) ** 2, axis=0, keepdims=True)
        h = (h - mean) / jnp.sqrt(var + BN_EPS) * params[f"g{i+1}"] + params[f"be{i+1}"]
        h = jnp.maximum(h, 0.0)
    return jnp.dot(h, w("w4")) + params["b4"]


if __name__ == "__main__":
    B, INPUT_SIZE, OUTPUT_SIZE = 8, 32, 10

    key = jax.random.PRNGKey(0)
    k_x, k_p = jax.random.split(key)
    x = jax.random.normal(k_x, (B, INPUT_SIZE), jnp.float32)
    params = init_params(k_p, INPUT_SIZE, OUTPUT_SIZE)

    out = classifier_forward(x, params)
    out = jax.block_until_ready(out)

    # Compare against a reference using the same bf16-rounded weights so the
    # check isolates kernel math (bias-drop + one-pass BN are exact rewrites).
    ref = reference_forward(x, params, weights_dtype=jnp.bfloat16)
    assert out.shape == (B, OUTPUT_SIZE)
    assert jnp.allclose(out, ref, atol=1e-3, rtol=1e-3), "mismatch vs reference"

    print("KERNEL_OK")
</pallas_src>

<mosaic_0001>
module attributes {stable_mosaic.version = 11 : i64} {
  func.func @classifier_kernel(%arg0: memref<8x128xf32, #tpu.memory_space<vmem>>, %arg1: memref<128x512xbf16, #tpu.memory_space<vmem>>, %arg2: memref<1x512xf32, #tpu.memory_space<vmem>>, %arg3: memref<1x512xf32, #tpu.memory_space<vmem>>, %arg4: memref<512x128xbf16, #tpu.memory_space<vmem>>, %arg5: memref<1x128xf32, #tpu.memory_space<vmem>>, %arg6: memref<1x128xf32, #tpu.memory_space<vmem>>, %arg7: memref<128x64xbf16, #tpu.memory_space<vmem>>, %arg8: memref<1x64xf32, #tpu.memory_space<vmem>>, %arg9: memref<1x64xf32, #tpu.memory_space<vmem>>, %arg10: memref<64x128xbf16, #tpu.memory_space<vmem>>, %arg11: memref<1x128xf32, #tpu.memory_space<vmem>>, %arg12: memref<8x128xf32, #tpu.memory_space<vmem>>) attributes {dimension_semantics = [], scalar_prefetch = 0 : i64, scratch_operands = 0 : i64, tpu.core_type = #tpu.core_type<tc>} {
    %c0 = arith.constant 0 : index
    %c0_0 = arith.constant 0 : index
    %0 = vector.load %arg0[%c0, %c0_0] : memref<8x128xf32, #tpu.memory_space<vmem>>, vector<8x128xf32>
    %c0_1 = arith.constant 0 : index
    %c0_2 = arith.constant 0 : index
    %1 = vector.load %arg1[%c0_1, %c0_2] : memref<128x512xbf16, #tpu.memory_space<vmem>>, vector<128x512xbf16>
    %2 = arith.extf %1 : vector<128x512xbf16> to vector<128x512xf32>
    %cst = arith.constant dense<0.000000e+00> : vector<8x512xf32>
    %3 = tpu.matmul %0, %2, %cst {dimension_numbers = #tpu.dot_dimension_numbers<[1], [0], [0], [1], [0, 0, 1, 1], [], []>} : vector<8x128xf32>, vector<128x512xf32>, vector<8x512xf32> -> vector<8x512xf32>
    %c0_3 = arith.constant 0 : index
    %c0_4 = arith.constant 0 : index
    %4 = vector.load %arg2[%c0_3, %c0_4] : memref<1x512xf32, #tpu.memory_space<vmem>>, vector<1x512xf32>
    %c0_5 = arith.constant 0 : index
    %c0_6 = arith.constant 0 : index
    %5 = vector.load %arg3[%c0_5, %c0_6] : memref<1x512xf32, #tpu.memory_space<vmem>>, vector<1x512xf32>
    %cst_7 = arith.constant dense<0.000000e+00> : vector<512xf32>
    %6 = vector.multi_reduction <add>, %3, %cst_7 [0] : vector<8x512xf32> to vector<512xf32>
    %7 = vector.shape_cast %6 : vector<512xf32> to vector<1x512xf32>
    %8 = arith.mulf %3, %3 : vector<8x512xf32>
    %cst_8 = arith.constant dense<0.000000e+00> : vector<512xf32>
    %9 = vector.multi_reduction <add>, %8, %cst_8 [0] : vector<8x512xf32> to vector<512xf32>
    %10 = vector.shape_cast %9 : vector<512xf32> to vector<1x512xf32>
    %cst_9 = arith.constant 1.250000e-01 : f32
    %11 = vector.broadcast %cst_9 : f32 to vector<1x512xf32>
    %12 = arith.mulf %7, %11 : vector<1x512xf32>
    %cst_10 = arith.constant 1.250000e-01 : f32
    %13 = vector.broadcast %cst_10 : f32 to vector<1x512xf32>
    %14 = arith.mulf %10, %13 : vector<1x512xf32>
    %15 = arith.mulf %12, %12 : vector<1x512xf32>
    %16 = arith.subf %14, %15 : vector<1x512xf32>
    %cst_11 = arith.constant 9.99999974E-6 : f32
    %17 = vector.broadcast %cst_11 : f32 to vector<1x512xf32>
    %18 = arith.addf %16, %17 : vector<1x512xf32>
    %19 = math.rsqrt %18 : vector<1x512xf32>
    %20 = arith.mulf %4, %19 : vector<1x512xf32>
    %21 = arith.mulf %12, %20 : vector<1x512xf32>
    %22 = arith.subf %5, %21 : vector<1x512xf32>
    %23 = vector.broadcast %20 : vector<1x512xf32> to vector<8x512xf32>
    %24 = arith.mulf %3, %23 : vector<8x512xf32>
    %25 = vector.broadcast %22 : vector<1x512xf32> to vector<8x512xf32>
    %26 = arith.addf %24, %25 : vector<8x512xf32>
    %cst_12 = arith.constant 0.000000e+00 : f32
    %27 = vector.broadcast %cst_12 : f32 to vector<8x512xf32>
    %28 = arith.maximumf %26, %27 : vector<8x512xf32>
    %c0_13 = arith.constant 0 : index
    %c0_14 = arith.constant 0 : index
    %29 = vector.load %arg4[%c0_13, %c0_14] : memref<512x128xbf16, #tpu.memory_space<vmem>>, vector<512x128xbf16>
    %30 = arith.extf %29 : vector<512x128xbf16> to vector<512x128xf32>
    %cst_15 = arith.constant dense<0.000000e+00> : vector<8x128xf32>
    %31 = tpu.matmul %28, %30, %cst_15 {dimension_numbers = #tpu.dot_dimension_numbers<[1], [0], [0], [1], [0, 0, 1, 1], [], []>} : vector<8x512xf32>, vector<512x128xf32>, vector<8x128xf32> -> vector<8x128xf32>
    %c0_16 = arith.constant 0 : index
    %c0_17 = arith.constant 0 : index
    %32 = vector.load %arg5[%c0_16, %c0_17] : memref<1x128xf32, #tpu.memory_space<vmem>>, vector<1x128xf32>
    %c0_18 = arith.constant 0 : index
    %c0_19 = arith.constant 0 : index
    %33 = vector.load %arg6[%c0_18, %c0_19] : memref<1x128xf32, #tpu.memory_space<vmem>>, vector<1x128xf32>
    %cst_20 = arith.constant dense<0.000000e+00> : vector<128xf32>
    %34 = vector.multi_reduction <add>, %31, %cst_20 [0] : vector<8x128xf32> to vector<128xf32>
    %35 = vector.shape_cast %34 : vector<128xf32> to vector<1x128xf32>
    %36 = arith.mulf %31, %31 : vector<8x128xf32>
    %cst_21 = arith.constant dense<0.000000e+00> : vector<128xf32>
    %37 = vector.multi_reduction <add>, %36, %cst_21 [0] : vector<8x128xf32> to vector<128xf32>
    %38 = vector.shape_cast %37 : vector<128xf32> to vector<1x128xf32>
    %cst_22 = arith.constant 1.250000e-01 : f32
    %39 = vector.broadcast %cst_22 : f32 to vector<1x128xf32>
    %40 = arith.mulf %35, %39 : vector<1x128xf32>
    %cst_23 = arith.constant 1.250000e-01 : f32
    %41 = vector.broadcast %cst_23 : f32 to vector<1x128xf32>
    %42 = arith.mulf %38, %41 : vector<1x128xf32>
    %43 = arith.mulf %40, %40 : vector<1x128xf32>
    %44 = arith.subf %42, %43 : vector<1x128xf32>
    %cst_24 = arith.constant 9.99999974E-6 : f32
    %45 = vector.broadcast %cst_24 : f32 to vector<1x128xf32>
    %46 = arith.addf %44, %45 : vector<1x128xf32>
    %47 = math.rsqrt %46 : vector<1x128xf32>
    %48 = arith.mulf %32, %47 : vector<1x128xf32>
    %49 = arith.mulf %40, %48 : vector<1x128xf32>
    %50 = arith.subf %33, %49 : vector<1x128xf32>
    %51 = vector.broadcast %48 : vector<1x128xf32> to vector<8x128xf32>
    %52 = arith.mulf %31, %51 : vector<8x128xf32>
    %53 = vector.broadcast %50 : vector<1x128xf32> to vector<8x128xf32>
    %54 = arith.addf %52, %53 : vector<8x128xf32>
    %cst_25 = arith.constant 0.000000e+00 : f32
    %55 = vector.broadcast %cst_25 : f32 to vector<8x128xf32>
    %56 = arith.maximumf %54, %55 : vector<8x128xf32>
    %c0_26 = arith.constant 0 : index
    %c0_27 = arith.constant 0 : index
    %57 = vector.load %arg7[%c0_26, %c0_27] : memref<128x64xbf16, #tpu.memory_space<vmem>>, vector<128x64xbf16>
    %58 = arith.extf %57 : vector<128x64xbf16> to vector<128x64xf32>
    %cst_28 = arith.constant dense<0.000000e+00> : vector<8x64xf32>
    %59 = tpu.matmul %56, %58, %cst_28 {dimension_numbers = #tpu.dot_dimension_numbers<[1], [0], [0], [1], [0, 0, 1, 1], [], []>} : vector<8x128xf32>, vector<128x64xf32>, vector<8x64xf32> -> vector<8x64xf32>
    %c0_29 = arith.constant 0 : index
    %c0_30 = arith.constant 0 : index
    %60 = vector.load %arg8[%c0_29, %c0_30] : memref<1x64xf32, #tpu.memory_space<vmem>>, vector<1x64xf32>
    %c0_31 = arith.constant 0 : index
    %c0_32 = arith.constant 0 : index
    %61 = vector.load %arg9[%c0_31, %c0_32] : memref<1x64xf32, #tpu.memory_space<vmem>>, vector<1x64xf32>
    %cst_33 = arith.constant dense<0.000000e+00> : vector<64xf32>
    %62 = vector.multi_reduction <add>, %59, %cst_33 [0] : vector<8x64xf32> to vector<64xf32>
    %63 = vector.shape_cast %62 : vector<64xf32> to vector<1x64xf32>
    %64 = arith.mulf %59, %59 : vector<8x64xf32>
    %cst_34 = arith.constant dense<0.000000e+00> : vector<64xf32>
    %65 = vector.multi_reduction <add>, %64, %cst_34 [0] : vector<8x64xf32> to vector<64xf32>
    %66 = vector.shape_cast %65 : vector<64xf32> to vector<1x64xf32>
    %cst_35 = arith.constant 1.250000e-01 : f32
    %67 = vector.broadcast %cst_35 : f32 to vector<1x64xf32>
    %68 = arith.mulf %63, %67 : vector<1x64xf32>
    %cst_36 = arith.constant 1.250000e-01 : f32
    %69 = vector.broadcast %cst_36 : f32 to vector<1x64xf32>
    %70 = arith.mulf %66, %69 : vector<1x64xf32>
    %71 = arith.mulf %68, %68 : vector<1x64xf32>
    %72 = arith.subf %70, %71 : vector<1x64xf32>
    %cst_37 = arith.constant 9.99999974E-6 : f32
    %73 = vector.broadcast %cst_37 : f32 to vector<1x64xf32>
    %74 = arith.addf %72, %73 : vector<1x64xf32>
    %75 = math.rsqrt %74 : vector<1x64xf32>
    %76 = arith.mulf %60, %75 : vector<1x64xf32>
    %77 = arith.mulf %68, %76 : vector<1x64xf32>
    %78 = arith.subf %61, %77 : vector<1x64xf32>
    %79 = vector.broadcast %76 : vector<1x64xf32> to vector<8x64xf32>
    %80 = arith.mulf %59, %79 : vector<8x64xf32>
    %81 = vector.broadcast %78 : vector<1x64xf32> to vector<8x64xf32>
    %82 = arith.addf %80, %81 : vector<8x64xf32>
    %cst_38 = arith.constant 0.000000e+00 : f32
    %83 = vector.broadcast %cst_38 : f32 to vector<8x64xf32>
    %84 = arith.maximumf %82, %83 : vector<8x64xf32>
    %c0_39 = arith.constant 0 : index
    %c0_40 = arith.constant 0 : index
    %85 = vector.load %arg10[%c0_39, %c0_40] : memref<64x128xbf16, #tpu.memory_space<vmem>>, vector<64x128xbf16>
    %86 = arith.extf %85 : vector<64x128xbf16> to vector<64x128xf32>
    %cst_41 = arith.constant dense<0.000000e+00> : vector<8x128xf32>
    %87 = tpu.matmul %84, %86, %cst_41 {dimension_numbers = #tpu.dot_dimension_numbers<[1], [0], [0], [1], [0, 0, 1, 1], [], []>} : vector<8x64xf32>, vector<64x128xf32>, vector<8x128xf32> -> vector<8x128xf32>
    %c0_42 = arith.constant 0 : index
    %c0_43 = arith.constant 0 : index
    %88 = vector.load %arg11[%c0_42, %c0_43] : memref<1x128xf32, #tpu.memory_space<vmem>>, vector<1x128xf32>
    %89 = vector.broadcast %88 : vector<1x128xf32> to vector<8x128xf32>
    %90 = arith.addf %87, %89 : vector<8x128xf32>
    %c0_44 = arith.constant 0 : index
    %c0_45 = arith.constant 0 : index
    %91 = vector.load %arg12[%c0_44, %c0_45] : memref<8x128xf32, #tpu.memory_space<vmem>>, vector<8x128xf32>
    tpu.vector_store %arg12[%c0_44, %c0_45], %90 {strides = array<i32>} : memref<8x128xf32, #tpu.memory_space<vmem>>, vector<8x128xf32>,
    return
  }
}

</mosaic_0001>

<bundles_post_ra>
// kernel: tpu_custom_call.1
= control target key start
LH: loop header
LB: loop body
LE: loop exit
PB: predicated region body
PF: predicated region fallthrough
CT: control target
= control target key end

     0   :  { %17 = vsyncpa [#allocation3], 0  ;;  %s2004_s0 = inlined_call_operand.vmem [shape: f32[8,128], index: 0, kind: input, shape index: {}]   ;;  %s2005_s1 = inlined_call_operand.hbm [shape: bf16[128,512], index: 1, kind: input, shape index: {}]   ;;  %s2006_s2 = inlined_call_operand.vmem [shape: f32[1,512], index: 2, kind: input, shape index: {}]   ;;  %s2007_s3 = inlined_call_operand.vmem [shape: f32[1,512], index: 3, kind: input, shape index: {}]   ;;  %s2008_s4 = inlined_call_operand.hbm [shape: bf16[512,128], index: 4, kind: input, shape index: {}]   ;;  %s2009_s5 = inlined_call_operand.vmem [shape: f32[1,128], index: 5, kind: input, shape index: {}]   ;;  %s2010_s6 = inlined_call_operand.vmem [shape: f32[1,128], index: 6, kind: input, shape index: {}]   ;;  %s2011_s7 = inlined_call_operand.vmem [shape: bf16[128,64], index: 7, kind: input, shape index: {}]   ;;  %s2012_s8 = inlined_call_operand.vmem [shape: f32[1,64], index: 8, kind: input, shape index: {}]   ;;  %s2013_s9 = inlined_call_operand.vmem [shape: f32[1,64], index: 9, kind: input, shape index: {}]   ;;  %s2014_s10 = inlined_call_operand.vmem [shape: bf16[64,128], index: 10, kind: input, shape index: {}]   ;;  %s2015_s11 = inlined_call_operand.vmem [shape: f32[1,128], index: 11, kind: input, shape index: {}]   ;;  %s2016_s12 = inlined_call_operand.hbm [shape: f32[8,128], index: 12, kind: output, shape index: {}]  }
   0x1   :  { %18 = vsyncpa [#allocation6], 0 }
   0x2   :  { %19 = vsyncpa [#allocation4], 0  ;;  %s1777_s21 = smov [#allocation2]   ;;  %s1705_s25 = scalar_lea.hbm %s2005_s1, 4096 }
   0x3   :  { %s27_s22 = sshll.u32 %s1777_s21, 4  ;;  %p1706_p0 = scmp.ne.s32.totalorder %s2005_s1, %s1705_s25  ;;  %s28_s22 = int_to_ptr.vmem [resolvable:$true] %s27_s22 }
   0x4   :  { %p1709_p1 = scmp.lt.u32.totalorder %s1705_s25, %s2005_s1 }
   0x6   :  { %p1711_p2 = pnand %p1709_p1, %p1706_p0 }
   0x8   :  { %1714 = shalt.err (!%p1711_p2)
}
   0x9   :  { %s1715_s30 = scalar_lea.vmem %s28_s22, 4096  ;;  %p1720_p4 = scmp.lt.s32.totalorder %s28_s22, %s28_s22 }
   0xa   :  { %p1716_p3 = scmp.ne.s32.totalorder %s28_s22, %s1715_s30  ;;  %p1721_p5 = scmp.lt.s32.totalorder %s1715_s30, %s1715_s30 }
   0xc   :  { %p1722_p6 = por %p1721_p5, %p1720_p4 }
   0xe   :  { %p1723_p7 = pnand %p1722_p6, %p1716_p3 }
  0x10   :  { %1726 = shalt.err (!%p1723_p7)
}
  0x11   :  { %s1778_s13 = smov 256   ;;  %s1779_s14 = smov 16  }
  0x12   :  { %33 = dma.hbm_to_vmem [thread:$0]  %s2005_s1, 4096, %s28_s22, [#allocation3], %s1778_s13, %s1778_s13, %s1779_s14  }
  0x13   :  { %s1780_s17 = smov [#allocation5]   ;;  %s1727_s21 = scalar_lea.hbm %s2008_s4, 4096 }
  0x14   :  { %s43_s18 = sshll.u32 %s1780_s17, 4  ;;  %p1728_p8 = scmp.ne.s32.totalorder %s2008_s4, %s1727_s21  ;;  %s44_s18 = int_to_ptr.vmem [resolvable:$true] %s43_s18 }
  0x15   :  { %p1731_p9 = scmp.lt.u32.totalorder %s1727_s21, %s2008_s4 }
  0x17   :  { %p1733_p10 = pnand %p1731_p9, %p1728_p8 }
  0x19   :  { %1736 = shalt.err (!%p1733_p10)
}
  0x1a   :  { %s1737_s27 = scalar_lea.vmem %s44_s18, 4096  ;;  %p1742_p12 = scmp.lt.s32.totalorder %s44_s18, %s44_s18 }
  0x1b   :  { %p1738_p11 = scmp.ne.s32.totalorder %s44_s18, %s1737_s27  ;;  %p1743_p13 = scmp.lt.s32.totalorder %s1737_s27, %s1737_s27 }
  0x1d   :  { %p1744_p0 = por %p1743_p13, %p1742_p12 }
  0x1f   :  { %p1745_p1 = pnand %p1744_p0, %p1738_p11 }
  0x21   :  { %1748 = shalt.err (!%p1745_p1)
}
  0x22   :  { %s1781_s1 = smov 64   ;;  %s1782_s22 = smov 4  }
  0x23   :  { %49 = dma.hbm_to_vmem [thread:$0]  %s2008_s4, 4096, %s44_s18, [#allocation6], %s1781_s1, %s1781_s1, %s1782_s22  }
  0x24   :  { %1771 = dma.done.wait [#allocation3], 4096  }
  0x25   :  { %1772 = vsyncadd [#allocation3], 4294963200 }
  0x26   :  { %1773 = dma.done.wait [#allocation6], 4096  }
  0x27   :  { %1774 = vsyncadd [#allocation6], 4294963200  ;;  %v1783_v0 = vmov 0.0   ;;  %v1645_v1 = vld [vmem:[#allocation2 + $0x4] ss:$16 sps:$4 sm:$0xff]   ;;  %v1255_v38 = vld [vmem:[#allocation5 + $0x48] sm:$0xff]  }
  0x28   :  { %231 = vmatprep.mubr.f32.mxu0 %v1783_v0  ;;  %302 = vmatprep.mubr.f32.mxu1 %v1783_v0  ;;  %v1647_v2 = vld [vmem:[#allocation2 + $0xc] ss:$16 sps:$4 sm:$0xff]   ;;  %v1649_v3 = vld [vmem:[#allocation2] ss:$16 sps:$4 sm:$0xff]   ;;  %v1650_v4 = vld [vmem:[#allocation2 + $0x8] ss:$16 sps:$4 sm:$0xff]  }
  0x29   :  { %1439 = vmatprep.subr.bf16.mxu0 %v1645_v1  ;;  %1471 = vmatprep.subr.bf16.mxu1 %v1647_v2  ;;  %v1651_v5 = vld [vmem:[#allocation2 + $0x24] ss:$16 sps:$4 sm:$0xff]   ;;  %v1653_v6 = vld [vmem:[#allocation2 + $0x2c] ss:$16 sps:$4 sm:$0xff]   ;;  %v1655_v7 = vld [vmem:[#allocation2 + $0x20] ss:$16 sps:$4 sm:$0xff]  }
  0x2a   :  { %1441 = vmatpush1.bf16.msra.mxu0 %v1649_v3  ;;  %1473 = vmatpush1.bf16.msra.mxu1 %v1650_v4  ;;  %v1656_v8 = vld [vmem:[#allocation2 + $0x28] ss:$16 sps:$4 sm:$0xff]   ;;  %v1657_v9 = vld [vmem:[#allocation2 + $0x44] ss:$16 sps:$4 sm:$0xff]   ;;  %v1659_v10 = vld [vmem:[#allocation2 + $0x4c] ss:$16 sps:$4 sm:$0xff]  }
  0x2b   :  { %1443 = vmatprep.subr.bf16.mxu0 %v1651_v5  ;;  %1475 = vmatprep.subr.bf16.mxu1 %v1653_v6  ;;  %v1661_v11 = vld [vmem:[#allocation2 + $0x40] ss:$16 sps:$4 sm:$0xff]   ;;  %v1662_v12 = vld [vmem:[#allocation2 + $0x48] ss:$16 sps:$4 sm:$0xff]   ;;  %v1663_v13 = vld [vmem:[#allocation2 + $0x64] ss:$16 sps:$4 sm:$0xff]  }
  0x2c   :  { %v1665_v14 = vld [vmem:[#allocation2 + $0x6c] ss:$16 sps:$4 sm:$0xff]   ;;  %v1667_v15 = vld [vmem:[#allocation2 + $0x60] ss:$16 sps:$4 sm:$0xff]   ;;  %v1668_v16 = vld [vmem:[#allocation2 + $0x68] ss:$16 sps:$4 sm:$0xff]  }
  0x2d   :  { %v1669_v17 = vld [vmem:[#allocation2 + $0x84] ss:$16 sps:$4 sm:$0xff]   ;;  %v1671_v18 = vld [vmem:[#allocation2 + $0x8c] ss:$16 sps:$4 sm:$0xff]   ;;  %v1673_v19 = vld [vmem:[#allocation2 + $0x80] ss:$16 sps:$4 sm:$0xff]  }
  0x2e   :  { %1445 = vmatpush1.bf16.msra.mxu0 %v1655_v7  ;;  %1477 = vmatpush1.bf16.msra.mxu1 %v1656_v8  ;;  %v1674_v20 = vld [vmem:[#allocation2 + $0x88] ss:$16 sps:$4 sm:$0xff]   ;;  %v1675_v21 = vld [vmem:[#allocation2 + $0xa4] ss:$16 sps:$4 sm:$0xff]   ;;  %v1677_v22 = vld [vmem:[#allocation2 + $0xac] ss:$16 sps:$4 sm:$0xff]  }
  0x2f   :  { %1447 = vmatprep.subr.bf16.mxu0 %v1657_v9  ;;  %1479 = vmatprep.subr.bf16.mxu1 %v1659_v10  ;;  %v1679_v23 = vld [vmem:[#allocation2 + $0xa0] ss:$16 sps:$4 sm:$0xff]   ;;  %v1680_v24 = vld [vmem:[#allocation2 + $0xa8] ss:$16 sps:$4 sm:$0xff]   ;;  %v1681_v25 = vld [vmem:[#allocation2 + $0xc4] ss:$16 sps:$4 sm:$0xff]  }
  0x30   :  { %v1683_v26 = vld [vmem:[#allocation2 + $0xcc] ss:$16 sps:$4 sm:$0xff]   ;;  %v1685_v27 = vld [vmem:[#allocation2 + $0xc0] ss:$16 sps:$4 sm:$0xff]   ;;  %v1686_v28 = vld [vmem:[#allocation2 + $0xc8] ss:$16 sps:$4 sm:$0xff]  }
  0x31   :  { %v1687_v29 = vld [vmem:[#allocation2 + $0xe4] ss:$16 sps:$4 sm:$0xff]   ;;  %v1689_v30 = vld [vmem:[#allocation2 + $0xec] ss:$16 sps:$4 sm:$0xff]   ;;  %v1691_v31 = vld [vmem:[#allocation2 + $0xe0] ss:$16 sps:$4 sm:$0xff]  }
  0x32   :  { %1449 = vmatpush1.bf16.msra.mxu0 %v1661_v11  ;;  %1481 = vmatpush1.bf16.msra.mxu1 %v1662_v12  ;;  %v1692_v32 = vld [vmem:[#allocation2 + $0xe8] ss:$16 sps:$4 sm:$0xff]   ;;  %v70_v33 = vld [vmem:[%s2004_s0] sm:$0xff]  ;;  %v1256_v42 = vld [vmem:[#allocation5 + $0x50] sm:$0xff]   ;;  %vm1786_vm0 = vmmov 0   ;;  %vm916_vm1 = vcmask 523264  }
  0x33   :  { %1451 = vmatprep.subr.bf16.mxu0 %v1663_v13  ;;  %1483 = vmatprep.subr.bf16.mxu1 %v1665_v14  ;;  %v1254_v34 = vld [vmem:[#allocation5 + $0x40] sm:$0xff]   ;;  %v1271_v39 = vld [vmem:[#allocation5 + $0xc8] sm:$0xff]   ;;  %v1272_v43 = vld [vmem:[#allocation5 + $0xd0] sm:$0xff]  }
  0x34   :  { %v1270_v35 = vld [vmem:[#allocation5 + $0xc0] sm:$0xff]   ;;  %v1247_v40 = vld [vmem:[#allocation5 + $0x8] sm:$0xff]   ;;  %v1248_v44 = vld [vmem:[#allocation5 + $0x10] sm:$0xff]  }
  0x35   :  { %v1072_v36 = vld [vmem:[#allocation5] sm:$0xff]   ;;  %v1263_v41 = vld [vmem:[#allocation5 + $0x88] sm:$0xff]   ;;  %v1264_v45 = vld [vmem:[#allocation5 + $0x90] sm:$0xff]  }
  0x36   :  { %1453 = vmatpush1.bf16.msra.mxu0 %v1667_v15  ;;  %1485 = vmatpush1.bf16.msra.mxu1 %v1668_v16  ;;  %v1262_v37 = vld [vmem:[#allocation5 + $0x80] sm:$0xff]   ;;  %v1257_v46 = vld [vmem:[#allocation5 + $0x58] sm:$0xff]   ;;  %v1259_v54 = vld [vmem:[#allocation5 + $0x68] sm:$0xff]  }
  0x37   :  { %1455 = vmatprep.subr.bf16.mxu0 %v1669_v17  ;;  %1487 = vmatprep.subr.bf16.mxu1 %v1671_v18  ;;  %v1273_v47 = vld [vmem:[#allocation5 + $0xd8] sm:$0xff]   ;;  %v1258_v50 = vld [vmem:[#allocation5 + $0x60] sm:$0xff]   ;;  %v1275_v55 = vld [vmem:[#allocation5 + $0xe8] sm:$0xff]  }
  0x38   :  { %v1249_v48 = vld [vmem:[#allocation5 + $0x18] sm:$0xff]   ;;  %v1274_v51 = vld [vmem:[#allocation5 + $0xe0] sm:$0xff]   ;;  %v1251_v56 = vld [vmem:[#allocation5 + $0x28] sm:$0xff]  }
  0x39   :  { %v1265_v49 = vld [vmem:[#allocation5 + $0x98] sm:$0xff]   ;;  %v1250_v52 = vld [vmem:[#allocation5 + $0x20] sm:$0xff]   ;;  %v1267_v57 = vld [vmem:[#allocation5 + $0xa8] sm:$0xff]  }
  0x3a   :  { %1457 = vmatpush1.bf16.msra.mxu0 %v1673_v19  ;;  %1489 = vmatpush1.bf16.msra.mxu1 %v1674_v20  ;;  %v1266_v53 = vld [vmem:[#allocation5 + $0xa0] sm:$0xff]   ;;  %v1260_v58 = vld [vmem:[#allocation5 + $0x70] sm:$0xff]   ;;  %v1261_v62 = vld [vmem:[#allocation5 + $0x78] sm:$0xff]  }
  0x3b   :  { %1459 = vmatprep.subr.bf16.mxu0 %v1675_v21  ;;  %1491 = vmatprep.subr.bf16.mxu1 %v1677_v22  ;;  %v1276_v59 = vld [vmem:[#allocation5 + $0xf0] sm:$0xff]   ;;  %v1277_v63 = vld [vmem:[#allocation5 + $0xf8] sm:$0xff]  }
  0x3c   :  { %v1252_v60 = vld [vmem:[#allocation5 + $0x30] sm:$0xff]   ;;  %v1253_v1 = vld [vmem:[#allocation5 + $0x38] sm:$0xff]  }
  0x3d   :  { %v1268_v61 = vld [vmem:[#allocation5 + $0xb0] sm:$0xff]   ;;  %v1269_v2 = vld [vmem:[#allocation5 + $0xb8] sm:$0xff]  }
  0x3e   :  { %1461 = vmatpush1.bf16.msra.mxu0 %v1679_v23  ;;  %1493 = vmatpush1.bf16.msra.mxu1 %v1680_v24 }
  0x3f   :  { %1463 = vmatprep.subr.bf16.mxu0 %v1681_v25  ;;  %1495 = vmatprep.subr.bf16.mxu1 %v1683_v26 }
  0x42   :  { %1465 = vmatpush1.bf16.msra.mxu0 %v1685_v27  ;;  %1497 = vmatpush1.bf16.msra.mxu1 %v1686_v28 }
  0x43   :  { %1467 = vmatprep.subr.bf16.mxu0 %v1687_v29  ;;  %1499 = vmatprep.subr.bf16.mxu1 %v1689_v30 }
  0x46   :  { %1469 = vmatpush1.bf16.msra.mxu0 %v1691_v31  ;;  %1501 = vmatpush1.bf16.msra.mxu1 %v1692_v32 }
  0x47   :  { %1503 = vmatprep.subr.bf16.mxu0 %v1254_v34  ;;  %1535 = vmatprep.subr.bf16.mxu1 %v1270_v35 }
  0x49   :  { %232 = vmatmul.mubr.f32.vlgmr.msra.gmra.mrb[0].mxu0 %v70_v33  ;;  %303 = vmatmul.mubr.f32.vlgmr.msra.gmra.mrb[0].mxu1 %v70_v33 }
  0x4a   :  { %1505 = vmatpush3.bf16.msra.mxu0 %v1072_v36  ;;  %1537 = vmatpush3.bf16.msra.mxu1 %v1262_v37 }
  0x4b   :  { %1507 = vmatprep.subr.bf16.mxu0 %v1255_v38  ;;  %1539 = vmatprep.subr.bf16.mxu1 %v1271_v39 }
  0x4e   :  { %1509 = vmatpush3.bf16.msra.mxu0 %v1247_v40  ;;  %1541 = vmatpush3.bf16.msra.mxu1 %v1263_v41 }
  0x4f   :  { %1511 = vmatprep.subr.bf16.mxu0 %v1256_v42  ;;  %1543 = vmatprep.subr.bf16.mxu1 %v1272_v43 }
  0x52   :  { %1513 = vmatpush3.bf16.msra.mxu0 %v1248_v44  ;;  %1545 = vmatpush3.bf16.msra.mxu1 %v1264_v45 }
  0x53   :  { %1515 = vmatprep.subr.bf16.mxu0 %v1257_v46  ;;  %1547 = vmatprep.subr.bf16.mxu1 %v1273_v47 }
  0x56   :  { %1517 = vmatpush3.bf16.msra.mxu0 %v1249_v48  ;;  %1549 = vmatpush3.bf16.msra.mxu1 %v1265_v49 }
  0x57   :  { %1519 = vmatprep.subr.bf16.mxu0 %v1258_v50  ;;  %1551 = vmatprep.subr.bf16.mxu1 %v1274_v51 }
  0x5a   :  { %1521 = vmatpush3.bf16.msra.mxu0 %v1250_v52  ;;  %1553 = vmatpush3.bf16.msra.mxu1 %v1266_v53 }
  0x5b   :  { %1523 = vmatprep.subr.bf16.mxu0 %v1259_v54  ;;  %1555 = vmatprep.subr.bf16.mxu1 %v1275_v55 }
  0x5e   :  { %1525 = vmatpush3.bf16.msra.mxu0 %v1251_v56  ;;  %1557 = vmatpush3.bf16.msra.mxu1 %v1267_v57 }
  0x5f   :  { %1527 = vmatprep.subr.bf16.mxu0 %v1260_v58  ;;  %1559 = vmatprep.subr.bf16.mxu1 %v1276_v59 }
  0x62   :  { %1529 = vmatpush3.bf16.msra.mxu0 %v1252_v60  ;;  %1561 = vmatpush3.bf16.msra.mxu1 %v1268_v61 }
  0x63   :  { %1531 = vmatprep.subr.bf16.mxu0 %v1261_v62  ;;  %1563 = vmatprep.subr.bf16.mxu1 %v1277_v63 }
  0x66   :  { %1533 = vmatpush3.bf16.msra.mxu0 %v1253_v1  ;;  %1565 = vmatpush3.bf16.msra.mxu1 %v1269_v2 }
 0x11c   :  { %v1882_v3 = vpop.f32.mrb[0].mxu0  ;;  %v1884_v4 = vpop.f32.mrb[0].mxu1 }
 0x11d   :  { %v311_v5 = vrot.slane %v1882_v3, 4  ;;  %v335_v6 = vmul.f32 %v1882_v3, %v1882_v3  ;;  %v323_v7 = vrot.slane %v1884_v4, 4  ;;  %v337_v8 = vmul.f32 %v1884_v4, %v1884_v4  ;;  %v1892_v9 = vpop.f32.mrb[1].mxu0  ;;  %v1894_v10 = vpop.f32.mrb[1].mxu1 }
 0x11e   :  { %v317_v11 = vrot.slane %v1892_v9, 4  ;;  %v336_v12 = vmul.f32 %v1892_v9, %v1892_v9  ;;  %v329_v13 = vrot.slane %v1894_v10, 4  ;;  %v338_v14 = vmul.f32 %v1894_v10, %v1894_v10 }
 0x11f   :  { %v312_v15 = vadd.f32 %v311_v5, %v1882_v3  ;;  %v339_v16 = vrot.slane %v335_v6, 4  ;;  %v324_v17 = vadd.f32 %v323_v7, %v1884_v4  ;;  %v351_v18 = vrot.slane %v337_v8, 4 }
 0x120   :  { %v318_v19 = vadd.f32 %v317_v11, %v1892_v9  ;;  %v345_v20 = vrot.slane %v336_v12, 4  ;;  %v330_v21 = vadd.f32 %v329_v13, %v1894_v10  ;;  %v357_v22 = vrot.slane %v338_v14, 4 }
 0x121   :  { %v313_v23 = vrot.slane %v312_v15, 2  ;;  %v340_v24 = vadd.f32 %v339_v16, %v335_v6  ;;  %v325_v25 = vrot.slane %v324_v17, 2  ;;  %v352_v26 = vadd.f32 %v351_v18, %v337_v8 }
 0x122   :  { %v319_v27 = vrot.slane %v318_v19, 2  ;;  %v346_v28 = vadd.f32 %v345_v20, %v336_v12  ;;  %v331_v29 = vrot.slane %v330_v21, 2  ;;  %v358_v30 = vadd.f32 %v357_v22, %v338_v14 }
 0x123   :  { %v314_v31 = vadd.f32 %v313_v23, %v312_v15  ;;  %v341_v32 = vrot.slane %v340_v24, 2  ;;  %v326_v33 = vadd.f32 %v325_v25, %v324_v17  ;;  %v353_v34 = vrot.slane %v352_v26, 2 }
 0x124   :  { %v320_v35 = vadd.f32 %v319_v27, %v318_v19  ;;  %v347_v36 = vrot.slane %v346_v28, 2  ;;  %v332_v37 = vadd.f32 %v331_v29, %v330_v21  ;;  %v359_v38 = vrot.slane %v358_v30, 2 }
 0x125   :  { %v315_v39 = vrot.slane %v314_v31, 1  ;;  %v342_v40 = vadd.f32 %v341_v32, %v340_v24  ;;  %v327_v41 = vrot.slane %v326_v33, 1  ;;  %v354_v42 = vadd.f32 %v353_v34, %v352_v26 }
 0x126   :  { %v321_v43 = vrot.slane %v320_v35, 1  ;;  %v348_v44 = vadd.f32 %v347_v36, %v346_v28  ;;  %v333_v45 = vrot.slane %v332_v37, 1  ;;  %v360_v46 = vadd.f32 %v359_v38, %v358_v30 }
 0x127   :  { %v316_v47 = vadd.f32 %v315_v39, %v314_v31  ;;  %v343_v48 = vrot.slane %v342_v40, 1  ;;  %v328_v49 = vadd.f32 %v327_v41, %v326_v33  ;;  %v355_v50 = vrot.slane %v354_v42, 1 }
 0x128   :  { %v322_v51 = vadd.f32 %v321_v43, %v320_v35  ;;  %v349_v52 = vrot.slane %v348_v44, 1  ;;  %v334_v53 = vadd.f32 %v333_v45, %v332_v37  ;;  %v361_v54 = vrot.slane %v360_v46, 1  ;;  %v309_v35 = vld [vmem:[%s2006_s2] sm:$0xf] }
 0x129   :  { %v344_v55 = vadd.f32 %v343_v48, %v342_v40  ;;  %v363_v56 = vmul.f32 0.125, %v316_v47  ;;  %v356_v57 = vadd.f32 %v355_v50, %v354_v42  ;;  %v365_v58 = vmul.f32 0.125, %v328_v49 }
 0x12a   :  { %v350_v59 = vadd.f32 %v349_v52, %v348_v44  ;;  %v364_v60 = vmul.f32 0.125, %v322_v51  ;;  %v362_v61 = vadd.f32 %v361_v54, %v360_v46  ;;  %v366_v62 = vmul.f32 0.125, %v334_v53 }
 0x12b   :  { %v367_v63 = vmul.f32 0.125, %v344_v55  ;;  %v371_v1 = vmul.f32 %v363_v56, %v363_v56  ;;  %v369_v2 = vmul.f32 0.125, %v356_v57  ;;  %v373_v5 = vmul.f32 %v365_v58, %v365_v58 }
 0x12c   :  { %v368_v6 = vmul.f32 0.125, %v350_v59  ;;  %v372_v7 = vmul.f32 %v364_v60, %v364_v60  ;;  %v370_v8 = vmul.f32 0.125, %v362_v61  ;;  %v374_v11 = vmul.f32 %v366_v62, %v366_v62 }
 0x12d   :  { %v375_v12 = vsub.f32 %v367_v63, %v371_v1  ;;  %v377_v13 = vsub.f32 %v369_v2, %v373_v5  ;;  %v1784_v20 = vmov 1966171168   ;;  %v396_v22 = vlaneseq }
 0x12e   :  { %v376_v14 = vsub.f32 %v368_v6, %v372_v7  ;;  %v378_v15 = vsub.f32 %v370_v8, %v374_v11  ;;  %v394_v21 = vunpack.c.l.s4 %v1784_v20  ;;  %v1785_v11 = vmov 0.0|0.0  }
 0x12f   :  { %v379_v16 = vadd.f32 1e-05, %v375_v12  ;;  %v381_v17 = vadd.f32 1e-05, %v377_v13  ;;  %v397_v24 = vshrl.u32 %v396_v22, 7  ;;  %1566 = vmatprep.subr.bf16.mxu0 %v1785_v11  ;;  %v1200_v12 = vld [vmem:[%s2011_s7] sm:$0xff]   ;;  %1590 = vmatprep.subr.bf16.mxu1 %v1785_v11 }
 0x130   :  { %v380_v18 = vadd.f32 1e-05, %v376_v14  ;;  %v382_v19 = vadd.f32 1e-05, %v378_v15  ;;  %v395_v23 = vunpack.c.0.s8 %v394_v21  ;;  %v1278_v13 = vld [vmem:[%s2011_s7 + $0x8] sm:$0xff]   ;;  %v1279_v14 = vld [vmem:[%s2011_s7 + $0x10] sm:$0xff]  }
 0x131   :  { %1693 = vrsqrt.f32 %v379_v16  ;;  %v428_v36 = vsub.s32 2, %v397_v24  ;;  %v432_v38 = vsub.s32 3, %v397_v24  ;;  %v1909_v39 = vsub.s32 0, %v397_v24  ;;  %v1280_v15 = vld [vmem:[%s2011_s7 + $0x18] sm:$0xff]   ;;  %v1281_v16 = vld [vmem:[%s2011_s7 + $0x20] sm:$0xff]  }
 0x132   :  { %1695 = vrsqrt.f32 %v381_v17  ;;  %v398_v27 = vsub.s32 %v395_v23, %v397_v24  ;;  %v424_v40 = vsub.s32 1, %v397_v24  ;;  %v1282_v17 = vld [vmem:[%s2011_s7 + $0x28] sm:$0xff]  }
 0x133   :  { %1697 = vrsqrt.f32 %v380_v18  ;;  %v1284_v18 = vld [vmem:[%s2011_s7 + $0x38] sm:$0xff]  }
 0x134   :  { %1699 = vrsqrt.f32 %v382_v19 }
 0x13b   :  { %v1694_v25 = vpop.eup %1693 }
 0x13c   :  { %v1696_v26 = vpop.eup %1695 }
 0x13d   :  { %v1698_v28 = vpop.eup %1697 }
 0x13e   :  { %v1700_v29 = vpop.eup %1699  ;;  %v391_v30 = vcombine.low %v1694_v25, %v1698_v28 }
 0x13f   :  { %v392_v31 = vcombine.low %v1696_v26, %v1700_v29 }
 0x140   :  { %v399_v32 = vrot.slane %v391_v30, %v398_v27 }
 0x141   :  { %v406_v33 = vrot.slane %v392_v31, %v398_v27 }
 0x143   :  { %v407_v34 = vcombine.low %v399_v32, %v406_v33 }
 0x145   :  { %v414_v37 = vrot.slane %v407_v34, %v398_v27 }
 0x147   :  { %v416_v41 = vmul.f32 %v414_v37, %v309_v35 }
 0x149   :  { %v429_v42 = vrot.slane %v416_v41, %v428_v36  ;;  %v433_v43 = vrot.slane %v416_v41, %v432_v38  ;;  %v421_v44 = vrot.slane %v416_v41, %v1909_v39  ;;  %v425_v45 = vrot.slane %v416_v41, %v424_v40 }
 0x14b   :  { %v440_v46 = vmul.f32 %v429_v42, %v365_v58  ;;  %v441_v47 = vmul.f32 %v433_v43, %v366_v62  ;;  %v475_v48 = vmul.f32 %v433_v43, %v1894_v10  ;;  %v438_v49 = vmul.f32 %v421_v44, %v363_v56  ;;  %v310_v58 = vld [vmem:[%s2007_s3] sm:$0xf] }
 0x14c   :  { %v439_v50 = vmul.f32 %v425_v45, %v364_v60  ;;  %v473_v51 = vmul.f32 %v425_v45, %v1892_v9  ;;  %v472_v52 = vmul.f32 %v421_v44, %v1882_v3  ;;  %v474_v53 = vmul.f32 %v429_v42, %v1884_v4  ;;  %v773_v45 = vld [vmem:[%s2009_s5] sm:$0x1] }
 0x14d   :  { %v447_v54 = vcombine.low %v440_v46, %v441_v47 }
 0x14e   :  { %v446_v55 = vcombine.low %v438_v49, %v439_v50 }
 0x14f   :  { %v461_v57 = vrot.slane %v447_v54, %v398_v27 }
 0x150   :  { %v454_v59 = vrot.slane %v446_v55, %v398_v27 }
 0x152   :  { %v462_v61 = vcombine.low %v454_v59, %v461_v57  ;;  %v1232_v57 = vld [vmem:[%s2014_s10] sm:$0xff]   ;;  %v1285_v59 = vld [vmem:[%s2014_s10 + $0x8] sm:$0xff]  }
 0x154   :  { %v469_v62 = vrot.slane %v462_v61, %v398_v27  ;;  %v1286_v61 = vld [vmem:[%s2014_s10 + $0x10] sm:$0xff]  }
 0x156   :  { %v471_v63 = vsub.f32 %v310_v58, %v469_v62  ;;  %v1287_v58 = vld [vmem:[%s2014_s10 + $0x18] sm:$0xff]  }
 0x158   :  { %v484_v10 = vrot.slane %v471_v63, %v424_v40  ;;  %v492_v56 = vrot.slane %v471_v63, %v432_v38  ;;  %v480_v60 = vrot.slane %v471_v63, %v1909_v39  ;;  %v488_v9 = vrot.slane %v471_v63, %v428_v36 }
 0x15a   :  { %v498_v1 = vadd.f32 %v484_v10, %v473_v51  ;;  %v500_v3 = vadd.f32 %v492_v56, %v475_v48  ;;  %v497_v2 = vadd.f32 %v480_v60, %v472_v52  ;;  %v499_v4 = vadd.f32 %v488_v9, %v474_v53  ;;  %v774_v48 = vld [vmem:[%s2010_s6] sm:$0x1] }
 0x15c   :  { %v502_v5 = vmax.f32 %v498_v1, 0.0  ;;  %v504_v6 = vmax.f32 %v500_v3, 0.0  ;;  %v501_v7 = vmax.f32 %v497_v2, 0.0  ;;  %v503_v8 = vmax.f32 %v499_v4, 0.0 }
 0x15e   :  { %697 = vmatprep.mubr.f32.mxu0 %v502_v5  ;;  %767 = vmatprep.mubr.f32.mxu1 %v504_v6 }
 0x15f   :  { %698 = vmatmul.mubr.f32.vlgmr.msra.gmra.mrb[2].mxu0 %v501_v7  ;;  %768 = vmatmul.mubr.f32.vlgmr.msra.gmra.mrb[2].mxu1 %v503_v8 }
 0x160   :  { %1568 = vmatpush3.bf16.msra.mxu0 %v1200_v12  ;;  %1416 = vmatprep.mubr.msk.f32.mxu0 %vm1786_vm0, %v1783_v0 }
 0x161   :  { %1569 = vmatprep.subr.bf16.mxu0 %v1785_v11  ;;  %1435 = vmatprep.mubr.msk.f32.mxu1 %vm1786_vm0, %v1783_v0  ;;  %v1283_v0 = vld [vmem:[%s2011_s7 + $0x30] sm:$0xff]  }
 0x162   :  { %1592 = vmatpush3.bf16.msra.mxu1 %v1232_v57 }
 0x163   :  { %1593 = vmatprep.subr.bf16.mxu1 %v1785_v11 }
 0x164   :  { %1571 = vmatpush3.bf16.msra.mxu0 %v1278_v13 }
 0x165   :  { %1572 = vmatprep.subr.bf16.mxu0 %v1785_v11 }
 0x166   :  { %1595 = vmatpush3.bf16.msra.mxu1 %v1285_v59 }
 0x167   :  { %1596 = vmatprep.subr.bf16.mxu1 %v1785_v11 }
 0x168   :  { %1574 = vmatpush3.bf16.msra.mxu0 %v1279_v14 }
 0x169   :  { %1575 = vmatprep.subr.bf16.mxu0 %v1785_v11 }
 0x16a   :  { %1598 = vmatpush3.bf16.msra.mxu1 %v1286_v61 }
 0x16b   :  { %1599 = vmatprep.subr.bf16.mxu1 %v1785_v11 }
 0x16c   :  { %1577 = vmatpush3.bf16.msra.mxu0 %v1280_v15 }
 0x16d   :  { %1578 = vmatprep.subr.bf16.mxu0 %v1785_v11 }
 0x16e   :  { %1601 = vmatpush3.bf16.msra.mxu1 %v1287_v58 }
 0x170   :  { %1580 = vmatpush3.bf16.msra.mxu0 %v1281_v16 }
 0x171   :  { %1581 = vmatprep.subr.bf16.mxu0 %v1785_v11 }
 0x174   :  { %1583 = vmatpush3.bf16.msra.mxu0 %v1282_v17 }
 0x175   :  { %1584 = vmatprep.subr.bf16.mxu0 %v1785_v11 }
 0x178   :  { %1586 = vmatpush3.bf16.msra.mxu0 %v1283_v0 }
 0x179   :  { %1587 = vmatprep.subr.bf16.mxu0 %v1785_v11 }
 0x17c   :  { %1589 = vmatpush3.bf16.msra.mxu0 %v1284_v18  ;;  %v914_v18 = vld [vmem:[%s2012_s8] sm:$0x1]  ;;  %s1787_s8 = smov [#allocation7]  }
 0x17d   :  { %s1059_s21 = sshll.u32 %s1787_s8, 4  ;;  %s1060_s21 = int_to_ptr.vmem [resolvable:$true] %s1059_s21 }
 0x17e   :  { %p1754_p3 = scmp.lt.s32.totalorder %s1060_s21, %s1060_s21 }
 0x232   :  { %v1320_v19 = vpop.f32.mrb[2].mxu0  ;;  %v1355_v20 = vpop.f32.mrb[2].mxu1 }
 0x233   :  { %v1321_v21 = vpop.f32.mrb[3].mxu0  ;;  %v1356_v22 = vpop.f32.mrb[3].mxu1 }
 0x234   :  { %v1322_v23 = vadd.f32 %v1321_v21, %v1320_v19  ;;  %v1357_v24 = vadd.f32 %v1356_v22, %v1355_v20  ;;  %v915_v21 = vld [vmem:[%s2013_s9] sm:$0x1]  ;;  %s1749_s9 = scalar_lea.vmem %s1060_s21, 128 }
 0x235   :  { %p1750_p2 = scmp.ne.s32.totalorder %s1060_s21, %s1749_s9  ;;  %p1755_p4 = scmp.lt.s32.totalorder %s1749_s9, %s1749_s9 }
 0x236   :  { %v770_v25 = vadd.f32 %v1357_v24, %v1322_v23 }
 0x237   :  { %p1756_p5 = por %p1755_p4, %p1754_p3 }
 0x238   :  { %v775_v26 = vrot.slane %v770_v25, 4  ;;  %v781_v27 = vmul.f32 %v770_v25, %v770_v25 }
 0x239   :  { %p1757_p6 = pnand %p1756_p5, %p1750_p2 }
 0x23a   :  { %v776_v28 = vadd.f32 %v775_v26, %v770_v25  ;;  %v782_v29 = vrot.slane %v781_v27, 4 }
 0x23c   :  { %v777_v30 = vrot.slane %v776_v28, 2  ;;  %v783_v31 = vadd.f32 %v782_v29, %v781_v27  ;;  %v1069_v29 = vld [vmem:[%s2015_s11] ss:$0 sm:$0xff] }
 0x23e   :  { %v778_v32 = vadd.f32 %v777_v30, %v776_v28  ;;  %v784_v33 = vrot.slane %v783_v31, 2 }
 0x240   :  { %v779_v34 = vrot.slane %v778_v32, 1  ;;  %v785_v35 = vadd.f32 %v784_v33, %v783_v31 }
 0x242   :  { %v780_v36 = vadd.f32 %v779_v34, %v778_v32  ;;  %v786_v37 = vrot.slane %v785_v35, 1 }
 0x244   :  { %v787_v38 = vadd.f32 %v786_v37, %v785_v35  ;;  %v788_v40 = vmul.f32 0.125, %v780_v36 }
 0x246   :  { %v789_v41 = vmul.f32 0.125, %v787_v38  ;;  %v790_v42 = vmul.f32 %v788_v40, %v788_v40 }
 0x248   :  { %v791_v43 = vsub.f32 %v789_v41, %v790_v42 }
 0x24a   :  { %v792_v44 = vadd.f32 1e-05, %v791_v43 }
 0x24c   :  { %1701 = vrsqrt.f32 %v792_v44 }
 0x256   :  { %v1702_v46 = vpop.eup %1701 }
 0x257   :  { %v794_v47 = vmul.f32 %v1702_v46, %v773_v45 }
 0x259   :  { %v795_v49 = vmul.f32 %v794_v47, %v788_v40  ;;  %v801_v50 = vrot.slane %v794_v47, %v1909_v39 }
 0x25b   :  { %v796_v51 = vsub.f32 %v774_v48, %v795_v49  ;;  %v803_v52 = vmul.f32 %v801_v50, %v770_v25 }
 0x25d   :  { %v808_v53 = vrot.slane %v796_v51, %v1909_v39 }
 0x25f   :  { %v810_v54 = vadd.f32 %v808_v53, %v803_v52 }
 0x261   :  { %v811_v55 = vmax.f32 %v810_v54, 0.0 }
 0x263   :  { %1417 = vmatmul.mubr.f32.vlgmr.msra.gmra.mrb[4].mxu0 %v811_v55 }
 0x336   :  { %v910_v62 = vpop.f32.mrb[4].mxu0 }
 0x337   :  { %v917_v63 = vsel %vm916_vm1, %v910_v62, 0.0  ;;  %v924_v10 = vmul.f32 %v910_v62, %v910_v62  ;;  %v1418_v56 = vpop.f32.mrb[5].mxu0 }
 0x338   :  { %v918_v60 = vrot.slane %v917_v63, 4 }
 0x339   :  { %v925_v9 = vsel %vm916_vm1, %v924_v10, 0.0 }
 0x33a   :  { %v919_v1 = vadd.f32 %v918_v60, %v917_v63  ;;  %v926_v3 = vrot.slane %v925_v9, 4 }
 0x33c   :  { %v920_v2 = vrot.slane %v919_v1, 2  ;;  %v927_v4 = vadd.f32 %v926_v3, %v925_v9 }
 0x33e   :  { %v921_v5 = vadd.f32 %v920_v2, %v919_v1  ;;  %v928_v6 = vrot.slane %v927_v4, 2 }
 0x340   :  { %v922_v7 = vrot.slane %v921_v5, 1  ;;  %v929_v8 = vadd.f32 %v928_v6, %v927_v4 }
 0x342   :  { %v923_v11 = vadd.f32 %v922_v7, %v921_v5  ;;  %v930_v12 = vrot.slane %v929_v8, 1 }
 0x344   :  { %v931_v13 = vadd.f32 %v930_v12, %v929_v8  ;;  %v932_v14 = vmul.f32 0.125, %v923_v11 }
 0x346   :  { %v933_v15 = vmul.f32 0.125, %v931_v13  ;;  %v934_v16 = vmul.f32 %v932_v14, %v932_v14 }
 0x348   :  { %v935_v17 = vsub.f32 %v933_v15, %v934_v16 }
 0x34a   :  { %v936_v0 = vadd.f32 1e-05, %v935_v17 }
 0x34c   :  { %1703 = vrsqrt.f32 %v936_v0 }
 0x356   :  { %v1704_v19 = vpop.eup %1703 }
 0x357   :  { %v938_v20 = vmul.f32 %v1704_v19, %v914_v18 }
 0x359   :  { %v939_v22 = vmul.f32 %v938_v20, %v932_v14  ;;  %v945_v23 = vrot.slane %v938_v20, %v1909_v39 }
 0x35b   :  { %v940_v24 = vsub.f32 %v915_v21, %v939_v22  ;;  %v947_v25 = vmul.f32 %v945_v23, %v910_v62 }
 0x35d   :  { %v952_v26 = vrot.slane %v940_v24, %v1909_v39 }
 0x35f   :  { %v954_v27 = vadd.f32 %v952_v26, %v947_v25 }
 0x361   :  { %v955_v28 = vmax.f32 %v954_v27, 0.0 }
 0x363   :  { %1436 = vmatmul.mubr.msk.f32.vlgmr.msra.gmra.mrb[4].mxu1 %vm916_vm1, %v955_v28 }
 0x436   :  { %v1048_v30 = vpop.f32.mrb[4].mxu1 }
 0x437   :  { %v1049_v31 = vadd.f32 %v1069_v29, %v1048_v30  ;;  %v1437_v32 = vpop.f32.mrb[5].mxu1 }
 0x439   :  { %1052 = vst [vmem:[#allocation7] sm:$0xff] %v1049_v31 }
 0x43a   :  { %1760 = shalt.err (!%p1757_p6)
}
 0x43b   :  { %s1761_s25 = scalar_lea.hbm %s2016_s12, 128 }
 0x43c   :  { %p1762_p7 = scmp.ne.s32.totalorder %s2016_s12, %s1761_s25  ;;  %p1765_p8 = scmp.lt.u32.totalorder %s1761_s25, %s2016_s12 }
 0x43e   :  { %p1767_p9 = pnand %p1765_p8, %p1762_p7 }
 0x440   :  { %1770 = shalt.err (!%p1767_p9)
}
 0x441   :  { %1062 = dma.vmem_to_hbm [thread:$0]  %s1060_s21, 128, %s2016_s12, [#allocation4]  }
 0x442   :  { %1775 = dma.done.wait [#allocation4], 128  }
 0x443   :  { %1776 = vsyncadd [#allocation4], 4294967168 }
 0x444   :  { %1066 = vsyncpa [#allocation3], 1 }
 0x445   :  { %1067 = vsyncpa [#allocation6], 1 }
 0x446   :  { %1068 = vsyncpa [#allocation4], 1 }

</bundles_post_ra>
